<compile_context>
chip_gen: v7x
topology: tpu7x:2x2x1
jax: 0.10.0
libtpu: 0.0.40
codegen_flags: <defaults>
</compile_context>

<pallas_src>
import math
from functools import partial

import jax
import jax.numpy as jnp
from jax.experimental import pallas as pl
from jax.experimental.pallas import tpu as pltpu


def _round_up(x, m):
    return (x + m - 1) // m * m


def _embed_gather_kernel(ids_ref, lut_hbm, out_ref, row_buf, copy_sem, *,
                         scale, token_block):
    # ids_ref  : (n_tok_pad,)            int32, SMEM (scalar-prefetched)
    # lut_hbm  : (vocab, d_model)        f32,   HBM  (pl.ANY, manual DMA)
    # out_ref  : (token_block, d_model)  f32,   VMEM output tile
    # row_buf  : (token_block, d_model)  f32,   VMEM gather landing buffer
    # copy_sem : scalar DMA semaphore shared by all row copies of this step
    base = pl.program_id(0) * token_block

    # Issue all row-gather DMAs for this token block; they run concurrently.
    # Out-of-range ids would trip the DMA bounds check (like nn.Embedding
    # raising); padded token slots carry id 0 and their rows are sliced off
    # in the wrapper.
    @pl.loop(0, token_block)
    def _issue(j):
        tok = ids_ref[base + j]
        pltpu.make_async_copy(lut_hbm.at[tok], row_buf.at[j], copy_sem).start()

    # Wait for every row copy (all the same size, shared semaphore).
    @pl.loop(0, token_block)
    def _wait(j):
        pltpu.make_async_copy(lut_hbm.at[0], row_buf.at[j], copy_sem).wait()

    # Single VPU scale + store; exact w.r.t. lut[id] * sqrt(d_model) in f32.
    out_ref[...] = (row_buf[...] * scale).astype(out_ref.dtype)


def embeddings_forward(x_ids, lut, *, token_block=256):
    """x_ids: (batch, seq) int token ids; lut: (vocab, d_model) f32.

    Returns (batch, seq, d_model) f32 = lut[x_ids] * sqrt(d_model).
    """
    batch, seq = x_ids.shape
    vocab, d_model = lut.shape
    n_tok = batch * seq
    scale = math.sqrt(d_model)

    # Token tile: large enough to amortize per-step overhead (256 suits
    # v6e/v7x; 128 is fine on v5e), clamped for short sequences.  Must be a
    # multiple of 8 (sublane) -- the d_model (lane) dim uses the full array
    # extent so it is legal even when d_model < 128.
    tb = min(token_block, max(8, _round_up(n_tok, 8)))
    n_tok_pad = _round_up(n_tok, tb)

    ids_flat = (
        jnp.zeros((n_tok_pad,), jnp.int32)
        .at[:n_tok]
        .set(x_ids.reshape(n_tok).astype(jnp.int32))
    )

    grid = (n_tok_pad // tb,)

    cost = pl.CostEstimate(
        flops=n_tok_pad * d_model,                      # the scale multiply
        transcendentals=0,
        bytes_accessed=2 * n_tok_pad * d_model * 4      # gathered rows + out
        + n_tok_pad * 4,                                # ids
    )

    out_pad = pl.pallas_call(
        partial(_embed_gather_kernel, scale=scale, token_block=tb),
        out_shape=jax.ShapeDtypeStruct((n_tok_pad, d_model), lut.dtype),
        grid_spec=pltpu.PrefetchScalarGridSpec(
            num_scalar_prefetch=1,                      # ids -> SMEM
            grid=grid,
            in_specs=[
                # Table stays in HBM; rows are gathered manually per token.
                pl.BlockSpec(memory_space=pl.ANY),
            ],
            out_specs=pl.BlockSpec((tb, d_model), lambda i, ids: (i, 0)),
            scratch_shapes=[
                pltpu.VMEM((tb, d_model), lut.dtype),   # gather landing buffer
                pltpu.SemaphoreType.DMA(()),            # shared copy semaphore
            ],
        ),
        compiler_params=pltpu.CompilerParams(
            # Token axis is embarrassingly parallel -> 2-TC sharding on v7x.
            dimension_semantics=("parallel",),
        ),
        cost_estimate=cost,
    )(ids_flat, lut)

    return out_pad[:n_tok].reshape(batch, seq, d_model)


if __name__ == "__main__":
    # Small shapes consistent with the module: batch=2, seq=8, vocab=16, d_model=32.
    batch, seq = 2, 8
    vocab, d_model = 16, 32

    key = jax.random.PRNGKey(0)
    k_lut, k_ids = jax.random.split(key)

    # nn.Embedding default init: weight ~ N(0, 1)
    lut = jax.random.normal(k_lut, (vocab, d_model), dtype=jnp.float32)
    x_ids = jax.random.randint(k_ids, (batch, seq), 0, vocab, dtype=jnp.int32)

    out = embeddings_forward(x_ids, lut)
    out = jax.block_until_ready(out)

    # Reference check (plain JAX gather) -- gather path is exact in f32.
    ref = lut[x_ids] * math.sqrt(d_model)
    assert out.shape == (batch, seq, d_model)
    assert jnp.allclose(out, ref, atol=1e-6, rtol=1e-6)

    print("KERNEL_OK")
</pallas_src>

<mosaic_0001>
module attributes {stable_mosaic.version = 11 : i64} {
  func.func @_embed_gather_kernel(%arg0: i32, %arg1: memref<16xi32, #tpu.memory_space<smem>>, %arg2: memref<16x32xf32, #tpu.memory_space<any>>, %arg3: memref<16x32xf32, #tpu.memory_space<vmem>>, %arg4: memref<16x32xf32, #tpu.memory_space<vmem>>, %arg5: memref<!tpu.dma_semaphore, #tpu.memory_space<semaphore_mem>>) attributes {dimension_semantics = [#tpu.dimension_semantics<parallel>], iteration_bounds = array<i64: 1>, scalar_prefetch = 1 : i64, scratch_operands = 2 : i64, tpu.core_type = #tpu.core_type<tc>, window_params = [{}, {transform_indices = @transform_1, window_bounds = array<i64: 16, 32>}]} {
    %c16_i32 = arith.constant 16 : i32
    %0 = arith.muli %arg0, %c16_i32 : i32
    %c0_i32 = arith.constant 0 : i32
    %c16_i32_0 = arith.constant 16 : i32
    %1 = arith.addi %c0_i32, %c16_i32_0 : i32
    %c1_i32 = arith.constant 1 : i32
    scf.for %arg6 = %c0_i32 to %1 step %c1_i32  : i32 {
      %c1_i32_9 = arith.constant 1 : i32
      %7 = arith.muli %arg6, %c1_i32_9 : i32
      %c0_i32_10 = arith.constant 0 : i32
      %8 = arith.addi %c0_i32_10, %7 : i32
      %9 = arith.addi %0, %8 : i32
      %10 = arith.index_cast %9 : i32 to index
      %11 = memref.load %arg1[%10] : memref<16xi32, #tpu.memory_space<smem>>
      %c0_i32_11 = arith.constant 0 : i32
      %12 = tpu.memref_slice %arg2[%11, %c0_i32_11] : memref<16x32xf32, #tpu.memory_space<any>> -> memref<1x32xf32, #tpu.memory_space<any>>
      %13 = tpu.memref_squeeze %12 : memref<1x32xf32, #tpu.memory_space<any>> -> memref<32xf32, #tpu.memory_space<any>>
      %c0_i32_12 = arith.constant 0 : i32
      %14 = tpu.memref_slice %arg4[%8, %c0_i32_12] : memref<16x32xf32, #tpu.memory_space<vmem>> -> memref<1x32xf32, #tpu.memory_space<vmem>>
      %15 = tpu.memref_squeeze %14 : memref<1x32xf32, #tpu.memory_space<vmem>> -> memref<32xf32, #tpu.memory_space<vmem>>
      tpu.enqueue_dma source(%13 : memref<32xf32, #tpu.memory_space<any>>) target(%15 : memref<32xf32, #tpu.memory_space<vmem>>) target_semaphore(%arg5 : memref<!tpu.dma_semaphore, #tpu.memory_space<semaphore_mem>>)
    }
    %c16_i32_1 = arith.constant 16 : i32
    %c0_i32_2 = arith.constant 0 : i32
    %c16_i32_3 = arith.constant 16 : i32
    %2 = arith.addi %c0_i32_2, %c16_i32_3 : i32
    %c1_i32_4 = arith.constant 1 : i32
    scf.for %arg6 = %c0_i32_2 to %2 step %c1_i32_4  : i32 {
      %c1_i32_9 = arith.constant 1 : i32
      %7 = arith.muli %arg6, %c1_i32_9 : i32
      %c0_i32_10 = arith.constant 0 : i32
      %8 = arith.addi %c0_i32_10, %7 : i32
      %c0_i32_11 = arith.constant 0 : i32
      %c0_i32_12 = arith.constant 0 : i32
      %9 = tpu.memref_slice %arg2[%c0_i32_11, %c0_i32_12] : memref<16x32xf32, #tpu.memory_space<any>> -> memref<1x32xf32, #tpu.memory_space<any>>
      %10 = tpu.memref_squeeze %9 : memref<1x32xf32, #tpu.memory_space<any>> -> memref<32xf32, #tpu.memory_space<any>>
      %c0_i32_13 = arith.constant 0 : i32
      %11 = tpu.memref_slice %arg4[%8, %c0_i32_13] : memref<16x32xf32, #tpu.memory_space<vmem>> -> memref<1x32xf32, #tpu.memory_space<vmem>>
      %12 = tpu.memref_squeeze %11 : memref<1x32xf32, #tpu.memory_space<vmem>> -> memref<32xf32, #tpu.memory_space<vmem>>
      tpu.wait_dma2 semaphore(%arg5 : memref<!tpu.dma_semaphore, #tpu.memory_space<semaphore_mem>>) src(%10 : memref<32xf32, #tpu.memory_space<any>>) dst(%12 : memref<32xf32, #tpu.memory_space<vmem>>)
    }
    %c16_i32_5 = arith.constant 16 : i32
    %c0 = arith.constant 0 : index
    %c0_6 = arith.constant 0 : index
    %3 = vector.load %arg4[%c0, %c0_6] : memref<16x32xf32, #tpu.memory_space<vmem>>, vector<16x32xf32>
    %cst = arith.constant 5.65685415 : f32
    %4 = vector.broadcast %cst : f32 to vector<16x32xf32>
    %5 = arith.mulf %3, %4 : vector<16x32xf32>
    %c0_7 = arith.constant 0 : index
    %c0_8 = arith.constant 0 : index
    %6 = vector.load %arg3[%c0_7, %c0_8] : memref<16x32xf32, #tpu.memory_space<vmem>>, vector<16x32xf32>
    tpu.vector_store %arg3[%c0_7, %c0_8], %5 {strides = array<i32>} : memref<16x32xf32, #tpu.memory_space<vmem>>, vector<16x32xf32>,
    return
  }
  func.func @transform_1(%arg0: i32, %arg1: memref<16xi32, #tpu.memory_space<smem>>) -> (i32, i32) {
    %c0_i32 = arith.constant 0 : i32
    %c0_i32_0 = arith.constant 0 : i32
    return %arg0, %c0_i32 : i32, i32
  }
}

</mosaic_0001>

<bundles_post_ra>
// kernel: tpu_custom_call.1
= control target key start
LH: loop header
LB: loop body
LE: loop exit
PB: predicated region body
PF: predicated region fallthrough
CT: control target
= control target key end

     0   :  { %s248_s0 = inlined_call_operand.hbm [shape: s32[16], index: 0, kind: input, shape index: {}]   ;;  %s249_s1 = inlined_call_operand.hbm [shape: f32[16,32], index: 1, kind: input, shape index: {}]   ;;  %s250_s2 = inlined_call_operand.hbm [shape: f32[16,32], index: 2, kind: output, shape index: {}]  }
   0x1   :  { %s107_s11 = scalar_lea.hbm %s248_s0, 16 }
   0x2   :  { %p108_p0 = scmp.ne.s32.totalorder %s248_s0, %s107_s11  ;;  %p111_p1 = scmp.lt.u32.totalorder %s107_s11, %s248_s0 }
   0x4   :  { %p113_p2 = pnand %p111_p1, %p108_p0 }
   0x6   :  { %116 = shalt.err (!%p113_p2)  }
   0x7   :  { %s185_s16 = smov [#allocation5]  }
   0x8   :  { %8 = dma.hbm_to_smem %s248_s0, 16, %s185_s16, [#allocation4] }
   0x9   :  { %171 = dma.done.wait [#allocation4], 16 }
   0xa   :  { %172 = vsyncadd [#allocation4], 4294967280 }
   0xb   :  { %10 = sfence }
   0xc   :  { %11 = vsyncpa [#allocation7], 0  ;;  %s217_s19 = smov 0  }
   0xd LB: > { %s20_s20 = sld [smem:[#allocation5 + %s179_s19]]  ;;  %s23_s21 = scalar_lea.vmem [#allocation2], %s179_s19  ;;  %s179_s19 = sphi %s217_s19, %s18_s19  }
   0xe   : > { %s31_s22 = sshll.u32 %s23_s21, 4  ;;  %s119_s29 = scalar_lea.hbm %s249_s1, 256  ;;  %s32_s22 = int_to_ptr.vmem [resolvable:$true] %s31_s22 }
  0x13   : > { %s85_s23 = sshll.u32 %s20_s20, 4 }
  0x14   : > { %s22_s25 = scalar_lea.hbm %s249_s1, %s85_s23 }
  0x15   : > { %s117_s26 = scalar_lea.hbm %s22_s25, 16  ;;  %p120_p4 = scmp.lt.u32.totalorder %s22_s25, %s249_s1 }
  0x16   : > { %p118_p3 = scmp.ne.s32.totalorder %s22_s25, %s117_s26  ;;  %p121_p5 = scmp.lt.u32.totalorder %s119_s29, %s117_s26 }
  0x17   : > { %p123_p7 = scmp.lt.u32.totalorder %s117_s26, %s22_s25 }
  0x18   : > { %p122_p6 = por %p121_p5, %p120_p4 }
  0x1a   : > { %p124_p8 = por %p123_p7, %p122_p6 }
  0x1c   : > { %p125_p9 = pnand %p124_p8, %p118_p3 }
  0x1e   : > { %128 = shalt.err (!%p125_p9)  }
  0x1f   : > { %s129_s4 = scalar_lea.vmem %s32_s22, 16  ;;  %s186_s5 = smov [#allocation2]  }
  0x20   : > { %p130_p10 = scmp.ne.s32.totalorder %s32_s22, %s129_s4  ;;  %s131_s6 = sshll.u32 %s186_s5, 4  ;;  %s132_s6 = int_to_ptr.vmem [resolvable:$false] %s131_s6 }
  0x21   : > { %s133_s7 = scalar_lea.vmem %s132_s6, 256  ;;  %p134_p11 = scmp.lt.s32.totalorder %s32_s22, %s132_s6 }
  0x22   : > { %p135_p12 = scmp.lt.s32.totalorder %s133_s7, %s129_s4 }
  0x24   : > { %p136_p13 = por %p135_p12, %p134_p11 }
  0x26   : > { %p137_p0 = pnand %p136_p13, %p130_p10 }
  0x28   : > { %140 = shalt.err (!%p137_p0)  }
  0x29   : > { %34 = dma.hbm_to_vmem [thread:$0]  %s22_s25, 16, %s32_s22, [#allocation3] }
  0x2a   : > { %s18_s19 = sadd.s32 1, %s179_s19  }
  0x2b   : > { %p15_p1 = scmp.ge.s32.totalorder %s18_s19, 16  }
  0x2c   :  { %s181_s8 = smov (%p15_p1), 0  }
  0x2d   :  { %17 = sbr.rel (!%p15_p1) target bundleno = 13 (0xd), region = 40 }
  0x34 LB: > { %173 = dma.done.wait [#allocation3], 16  ;;  %s183_s8 = sphi %s181_s8, %s40_s8  }
  0x35   : > { %174 = vsyncadd [#allocation3], 4294967280  ;;  %s40_s8 = sadd.s32 1, %s183_s8  }
  0x36   : > { %p37_p2 = scmp.ge.s32.totalorder %s40_s8, 16  }
  0x37   :  { %v43_v0 = vld [vmem:[#allocation2] sm:$0xff] (%p37_p2)  ;;  %vm47_vm0 = vcmask (%p37_p2), 261120   ;;  %v44_v1 = vld [vmem:[#allocation2 + $0x8] sm:$0xff] (%p37_p2)  ;;  %s187_s9 = smov (%p37_p2), [#allocation6]  }
  0x38   :  { %39 = sbr.rel (!%p37_p2) target bundleno = 52 (0x34), region = 51  ;;  %v45_v2 = vmul.f32 (%p37_p2), 5.656854, %v43_v0  ;;  %v46_v3 = vmul.f32 (%p37_p2), 5.656854, %v44_v1  ;;  %s55_s10 = sshll.u32 (%p37_p2), %s187_s9, 4  ;;  %s56_s10 = int_to_ptr.vmem [resolvable:$true] %s55_s10 }
  0x39   :  { %s141_s1 = scalar_lea.vmem (%p37_p2), %s56_s10, 256  ;;  %p146_p4 = scmp.lt.s32.totalorder (%p37_p2), %s56_s10, %s56_s10 }
  0x3a   :  { %48 = vst.msk [vmem:[#allocation6] sm:$0xff] (%p37_p2), %vm47_vm0, %v45_v2  ;;  %49 = vst.msk [vmem:[#allocation6 + $0x8] sm:$0xff] (%p37_p2), %vm47_vm0, %v46_v3  ;;  %p142_p3 = scmp.ne.s32.totalorder (%p37_p2), %s56_s10, %s141_s1  ;;  %p147_p5 = scmp.lt.s32.totalorder (%p37_p2), %s141_s1, %s141_s1 }
  0x3c   :  { %p148_p6 = por (%p37_p2), %p147_p5, %p146_p4 }
  0x3e   :  { %p149_p7 = pnand (%p37_p2), %p148_p6, %p142_p3 }
  0x40   :  { %152 = shalt.err (!%p149_p7)
}
  0x41   :  { %s153_s13 = scalar_lea.hbm %s250_s2, 256 }
  0x42   :  { %p154_p8 = scmp.ne.s32.totalorder %s250_s2, %s153_s13  ;;  %p157_p9 = scmp.lt.u32.totalorder %s153_s13, %s250_s2 }
  0x44   :  { %p159_p10 = pnand %p157_p9, %p154_p8 }
  0x46   :  { %162 = shalt.err (!%p159_p10)
}
  0x47   :  { %s188_s18 = smov 128   ;;  %s189_s19 = smov 8  }
  0x48   :  { %61 = dma.vmem_to_hbm [thread:$0]  %s56_s10, 256, %s250_s2, [#allocation7], %s188_s18, %s188_s18, %s189_s19  }
  0x49   :  { %175 = dma.done.wait [#allocation7], 256  }
  0x4a   :  { %176 = vsyncadd [#allocation7], 4294967040 }
  0x4b   :  { %65 = vsyncpa [#allocation7], 1 }
  0x4c   :  { %66 = vsyncmov [#allocation3] }
  0x4f   :  { %s67_s22 = vpop.sfrf %66 }
  0x50   :  { %p86_p11 = scmp.ne.s32.totalorder %s67_s22, 0 }
  0x52   :  { %71 = shalt.err (%p86_p11)  }

</bundles_post_ra>
